<compile_context>
chip_gen: v5e
topology: v5e:2x2
jax: 0.10.0
libtpu: 0.0.40
codegen_flags: <defaults>
</compile_context>

<pallas_src>
import functools

import jax
import jax.numpy as jnp
from jax.experimental import pallas as pl
from jax.experimental.pallas import tpu as pltpu


def _int_pow(x, n: int):
    """x**n for static integer n >= 1 via an exact multiply chain."""
    assert n >= 1
    result = None
    base = x
    while n:
        if n & 1:
            result = base if result is None else result * base
        n >>= 1
        if n:
            base = base * base
    return result


def _asl_kernel(logits_ref, targets_ref, w_ref, out_ref, *,
                gamma_pos, gamma_neg, margin, eps, chunk, n_chunks):
    i = pl.program_id(1)  # reduction axis (row tiles handled by this core)

    @pl.when(i == 0)
    def _():
        out_ref[...] = jnp.zeros_like(out_ref)

    wdiff = w_ref[0:1, :]   # wpos - wneg, (1, C)
    wneg = w_ref[1:2, :]    # wneg,        (1, C)
    C = out_ref.shape[-1]

    def body(j, acc):
        off = pl.multiple_of(j * chunk, chunk)
        x = logits_ref[pl.ds(off, chunk), :].astype(jnp.float32)
        t = targets_ref[pl.ds(off, chunk), :].astype(jnp.float32)

        # sigmoid via a single EUP tanh (instead of exp + reciprocal).
        probs = 0.5 * (1.0 + jnp.tanh(0.5 * x))
        probs_m = jnp.maximum(probs - margin, 0.0)

        # loss_pos = t * log(clamp(probs, min=eps)) * (1 - probs)**gamma_pos
        loss_pos = t * jnp.log(jnp.maximum(probs, eps))
        loss_pos = loss_pos * _int_pow(1.0 - probs, gamma_pos)

        # loss_neg = (1 - t) * clamp(log(1 - probs_m), min=eps) * probs_m**gamma_neg
        # (clamping the log itself, exactly like the PyTorch reference)
        loss_neg = (1.0 - t) * jnp.maximum(jnp.log(1.0 - probs_m), eps)
        loss_neg = loss_neg * _int_pow(probs_m, gamma_neg)

        w = wneg + wdiff * t
        loss = w * (loss_pos + loss_neg)
        # Per-chunk: only a sublane reduce into a lane-aligned (1, C) carry.
        return acc + jnp.sum(loss, axis=0, keepdims=True)

    acc = jax.lax.fori_loop(0, n_chunks, body, jnp.zeros((1, C), jnp.float32))
    out_ref[...] += -acc[None, :, :]


def _round_up(x, m):
    return ((x + m - 1) // m) * m


def _round_down(x, m):
    return (x // m) * m


def _plan(B, C, logits_itemsize, targets_itemsize, *,
          target_block_bytes=4 << 20, target_chunk_bytes=256 << 10):
    """Pick (num_cores, padded_B, row tile, tiles/core, chunk rows, n_chunks)."""
    granule = 16 if min(logits_itemsize, targets_itemsize) < 4 else 8

    # Split across two TensorCores whenever there are >= 2 row granules
    # (mandatory for v7x megacore; near-free serialization on 1-TC chips).
    num_cores = 2 if _round_up(B, granule) >= 2 * granule else 1

    b_pad = _round_up(B, num_cores * granule)
    per_core = b_pad // num_cores

    # Largest row tile (multiple of granule, <= ~4 MiB f32 logits) dividing the
    # per-core row count.  Never fall back to a full-batch block.
    cap = max(granule, _round_down(target_block_bytes // (C * 4), granule))
    tb = min(cap, per_core)
    tb -= tb % granule
    while per_core % tb:
        tb -= granule
    tiles_per_core = per_core // tb

    # In-kernel chunk rows: keeps f32 intermediates at ~256 KiB regardless of
    # the DMA block size.
    chunk = max(granule, min(512, _round_down(target_chunk_bytes // (C * 4), granule)))
    chunk = min(chunk, tb)
    while tb % chunk:
        chunk -= granule
    n_chunks = tb // chunk

    return num_cores, b_pad, tb, tiles_per_core, chunk, n_chunks


def asymmetric_loss(logits, targets, rho, *, gamma_pos=1, gamma_neg=4.0,
                    margin=0.05, eps=1e-8):
    """Pallas TPU implementation of AsymmetricLoss.forward (returns scalar mean).

    Accepts bf16 logits/targets as-is (cast to f32 in-kernel) to cut HBM bytes.
    """
    B, C = logits.shape
    assert targets.shape == (B, C)

    gp = int(gamma_pos)
    gn = int(gamma_neg)
    if gp != gamma_pos or gp < 1 or gn != gamma_neg or gn < 1:
        # TODO(synk): non-integer gammas would need a float pow (exp/log) path.
        raise NotImplementedError(
            "asymmetric_loss kernel requires positive integer gamma_pos/gamma_neg")

    num_cores, b_pad, tb, tiles_per_core, chunk, n_chunks = _plan(
        B, C, logits.dtype.itemsize, targets.dtype.itemsize)

    if b_pad != B:
        # Padded rows: saturated positive logit + target 1 => exactly zero loss
        # (log(1)=0 and (1-1)**gamma=0), so only the divisor needs the true count.
        pad = b_pad - B
        logits = jnp.pad(logits, ((0, pad), (0, 0)), constant_values=100.0)
        targets = jnp.pad(targets, ((0, pad), (0, 0)), constant_values=1.0)

    rho = rho.reshape(1, C).astype(jnp.float32)
    wpos = jnp.exp(1.0 - rho)
    wneg = jnp.exp(rho)
    w2 = jnp.concatenate([wpos - wneg, wneg], axis=0)  # (2, C) f32

    kernel = functools.partial(
        _asl_kernel, gamma_pos=gp, gamma_neg=gn, margin=float(margin),
        eps=float(eps), chunk=chunk, n_chunks=n_chunks)

    in_itemsize = logits.dtype.itemsize + targets.dtype.itemsize
    # Double-buffered input blocks + w + out blocks + bounded chunk temps + slack.
    vmem_need = (2 * tb * C * in_itemsize + 4 * 2 * C * 4 + 2 * C * 4
                 + 12 * chunk * C * 4 + (2 << 20))
    vmem_limit = int(min(max(vmem_need, 16 << 20), 48 << 20))

    bytes_accessed = int(b_pad * C * in_itemsize + 2 * C * 4 + num_cores * C * 4)
    cost = pl.CostEstimate(flops=18 * b_pad * C,
                           transcendentals=3 * b_pad * C,   # tanh + 2 logs
                           bytes_accessed=bytes_accessed)

    data_map = lambda c, i: (c * tiles_per_core + i, 0)

    partials = pl.pallas_call(
        kernel,
        out_shape=jax.ShapeDtypeStruct((num_cores, 1, C), jnp.float32),
        grid_spec=pltpu.PrefetchScalarGridSpec(
            num_scalar_prefetch=0,
            grid=(num_cores, tiles_per_core),
            in_specs=[
                pl.BlockSpec((tb, C), data_map),            # logits tile
                pl.BlockSpec((tb, C), data_map),            # targets tile
                pl.BlockSpec((2, C), lambda c, i: (0, 0)),  # [wpos-wneg; wneg]
            ],
            out_specs=pl.BlockSpec((1, 1, C), lambda c, i: (c, 0, 0)),
        ),
        compiler_params=pltpu.CompilerParams(
            dimension_semantics=("parallel", "arbitrary"),
            vmem_limit_bytes=vmem_limit),
        cost_estimate=cost,
    )(logits, targets, w2)

    return jnp.sum(partials) / float(B * C)


def _reference(logits, targets, rho, gamma_pos=1, gamma_neg=4.0,
               margin=0.05, eps=1e-8):
    """Pure-JAX transcription of the PyTorch forward, for a sanity check."""
    logits = logits.astype(jnp.float32)
    targets = targets.astype(jnp.float32)
    wpos = jnp.exp(1.0 - rho)
    wneg = jnp.exp(rho)
    probs = jax.nn.sigmoid(logits)
    probs_m = jnp.maximum(probs - margin, 0.0)
    loss_pos = targets * jnp.log(jnp.maximum(probs, eps))
    loss_pos = loss_pos * (1.0 - probs) ** int(gamma_pos)
    loss_neg = (1.0 - targets) * jnp.maximum(jnp.log(1.0 - probs_m), eps)
    loss_neg = loss_neg * probs_m ** int(gamma_neg)
    w = wpos * targets + wneg * (1.0 - targets)
    return jnp.mean(-(w * (loss_pos + loss_neg)))


if __name__ == "__main__":
    key = jax.random.PRNGKey(0)

    # Case 1: tiny shape, single tile / single core, bf16 targets.
    B, C = 16, 128
    k1, k2, k3, key = jax.random.split(key, 4)
    logits = jax.random.normal(k1, (B, C), jnp.float32) * 2.0
    targets = jax.random.bernoulli(k2, 0.3, (B, C)).astype(jnp.bfloat16)
    rho = jax.random.uniform(k3, (C,), jnp.float32, minval=0.05, maxval=0.95)

    loss = jax.block_until_ready(asymmetric_loss(logits, targets, rho))
    ref = _reference(logits, targets, rho)
    assert jnp.allclose(loss, ref, rtol=5e-4, atol=5e-4), (loss, ref)

    # Case 2: batch not a multiple of the row granule -> exercises the padded
    # last rows and the two-core partial-sum path (grid = (2, tiles_per_core)).
    B2, C2 = 100, 128
    k1, k2, k3, key = jax.random.split(key, 4)
    logits2 = jax.random.normal(k1, (B2, C2), jnp.float32) * 2.0
    targets2 = jax.random.bernoulli(k2, 0.3, (B2, C2)).astype(jnp.float32)
    rho2 = jax.random.uniform(k3, (C2,), jnp.float32, minval=0.05, maxval=0.95)

    loss2 = jax.block_until_ready(asymmetric_loss(logits2, targets2, rho2))
    ref2 = _reference(logits2, targets2, rho2)
    assert jnp.allclose(loss2, ref2, rtol=5e-4, atol=5e-4), (loss2, ref2)

    print("KERNEL_OK")
</pallas_src>

<mosaic_0001>
module attributes {stable_mosaic.version = 11 : i64} {
  func.func @_asl_kernel(%arg0: i32, %arg1: i32, %arg2: memref<16x128xf32, #tpu.memory_space<vmem>>, %arg3: memref<16x128xbf16, #tpu.memory_space<vmem>>, %arg4: memref<2x128xf32, #tpu.memory_space<vmem>>, %arg5: memref<1x1x128xf32, #tpu.memory_space<vmem>>) attributes {dimension_semantics = [#tpu.dimension_semantics<parallel>, #tpu.dimension_semantics<arbitrary>], iteration_bounds = array<i64: 1, 1>, scalar_prefetch = 0 : i64, scratch_operands = 0 : i64, tpu.core_type = #tpu.core_type<tc>, window_params = [{transform_indices = @transform_0, window_bounds = array<i64: 16, 128>}, {transform_indices = @transform_1, window_bounds = array<i64: 16, 128>}, {pipeline_mode = #tpu.pipeline_mode<synchronous>, transform_indices = @transform_2, window_bounds = array<i64: 2, 128>}, {transform_indices = @transform_3, window_bounds = array<i64: 1, 1, 128>}]} {
    %c0_i32 = arith.constant 0 : i32
    %0 = arith.cmpi eq, %arg1, %c0_i32 : i32
    %1 = arith.extui %0 : i1 to i32
    %c0_i32_0 = arith.constant 0 : i32
    %2 = arith.cmpi ne, %1, %c0_i32_0 : i32
    scf.if %2 {
      %cst_24 = arith.constant 0.000000e+00 : f32
      %57 = vector.broadcast %cst_24 : f32 to vector<1x1x128xf32>
      %c0_25 = arith.constant 0 : index
      %c0_26 = arith.constant 0 : index
      %c0_27 = arith.constant 0 : index
      %58 = vector.load %arg5[%c0_25, %c0_26, %c0_27] : memref<1x1x128xf32, #tpu.memory_space<vmem>>, vector<1x1x128xf32>
      tpu.vector_store %arg5[%c0_25, %c0_26, %c0_27], %57 {strides = array<i32>} : memref<1x1x128xf32, #tpu.memory_space<vmem>>, vector<1x1x128xf32>,
    } else {
    }
    %c0 = arith.constant 0 : index
    %c0_1 = arith.constant 0 : index
    %3 = vector.load %arg4[%c0, %c0_1] : memref<2x128xf32, #tpu.memory_space<vmem>>, vector<1x128xf32>
    %c1 = arith.constant 1 : index
    %c0_2 = arith.constant 0 : index
    %4 = vector.load %arg4[%c1, %c0_2] : memref<2x128xf32, #tpu.memory_space<vmem>>, vector<1x128xf32>
    %cst = arith.constant 0.000000e+00 : f32
    %5 = vector.broadcast %cst : f32 to vector<1x128xf32>
    %c0_i32_3 = arith.constant 0 : i32
    %c16_i32 = arith.constant 16 : i32
    %6 = arith.muli %c0_i32_3, %c16_i32 : i32
    %7 = tpu.assume_multiple %6, 16 : i32
    %8 = arith.index_cast %7 : i32 to index
    %c0_4 = arith.constant 0 : index
    %9 = vector.load %arg2[%8, %c0_4] : memref<16x128xf32, #tpu.memory_space<vmem>>, vector<16x128xf32>
    %10 = arith.index_cast %7 : i32 to index
    %c0_5 = arith.constant 0 : index
    %11 = vector.load %arg3[%10, %c0_5] : memref<16x128xbf16, #tpu.memory_space<vmem>>, vector<16x128xbf16>
    %12 = arith.extf %11 : vector<16x128xbf16> to vector<16x128xf32>
    %cst_6 = arith.constant 5.000000e-01 : f32
    %13 = vector.broadcast %cst_6 : f32 to vector<16x128xf32>
    %14 = arith.mulf %13, %9 : vector<16x128xf32>
    %15 = math.tanh %14 : vector<16x128xf32>
    %cst_7 = arith.constant 1.000000e+00 : f32
    %16 = vector.broadcast %cst_7 : f32 to vector<16x128xf32>
    %17 = arith.addf %16, %15 : vector<16x128xf32>
    %cst_8 = arith.constant 5.000000e-01 : f32
    %18 = vector.broadcast %cst_8 : f32 to vector<16x128xf32>
    %19 = arith.mulf %18, %17 : vector<16x128xf32>
    %cst_9 = arith.constant 5.000000e-02 : f32
    %20 = vector.broadcast %cst_9 : f32 to vector<16x128xf32>
    %21 = arith.subf %19, %20 : vector<16x128xf32>
    %cst_10 = arith.constant 0.000000e+00 : f32
    %22 = vector.broadcast %cst_10 : f32 to vector<16x128xf32>
    %23 = arith.maximumf %21, %22 : vector<16x128xf32>
    %cst_11 = arith.constant 9.99999993E-9 : f32
    %24 = vector.broadcast %cst_11 : f32 to vector<16x128xf32>
    %25 = arith.maximumf %19, %24 : vector<16x128xf32>
    %26 = math.log %25 : vector<16x128xf32>
    %27 = arith.mulf %12, %26 : vector<16x128xf32>
    %cst_12 = arith.constant 1.000000e+00 : f32
    %28 = vector.broadcast %cst_12 : f32 to vector<16x128xf32>
    %29 = arith.subf %28, %19 : vector<16x128xf32>
    %30 = arith.mulf %27, %29 : vector<16x128xf32>
    %cst_13 = arith.constant 1.000000e+00 : f32
    %31 = vector.broadcast %cst_13 : f32 to vector<16x128xf32>
    %32 = arith.subf %31, %12 : vector<16x128xf32>
    %cst_14 = arith.constant 1.000000e+00 : f32
    %33 = vector.broadcast %cst_14 : f32 to vector<16x128xf32>
    %34 = arith.subf %33, %23 : vector<16x128xf32>
    %35 = math.log %34 : vector<16x128xf32>
    %cst_15 = arith.constant 9.99999993E-9 : f32
    %36 = vector.broadcast %cst_15 : f32 to vector<16x128xf32>
    %37 = arith.maximumf %35, %36 : vector<16x128xf32>
    %38 = arith.mulf %32, %37 : vector<16x128xf32>
    %39 = arith.mulf %23, %23 : vector<16x128xf32>
    %40 = arith.mulf %39, %39 : vector<16x128xf32>
    %41 = arith.mulf %38, %40 : vector<16x128xf32>
    %42 = vector.broadcast %3 : vector<1x128xf32> to vector<16x128xf32>
    %43 = arith.mulf %42, %12 : vector<16x128xf32>
    %44 = vector.broadcast %4 : vector<1x128xf32> to vector<16x128xf32>
    %45 = arith.addf %44, %43 : vector<16x128xf32>
    %46 = arith.addf %30, %41 : vector<16x128xf32>
    %47 = arith.mulf %45, %46 : vector<16x128xf32>
    %cst_16 = arith.constant dense<0.000000e+00> : vector<128xf32>
    %48 = vector.multi_reduction <add>, %47, %cst_16 [0] : vector<16x128xf32> to vector<128xf32>
    %49 = vector.shape_cast %48 : vector<128xf32> to vector<1x128xf32>
    %50 = arith.addf %5, %49 : vector<1x128xf32>
    %c1_i32 = arith.constant 1 : i32
    %c0_17 = arith.constant 0 : index
    %c0_18 = arith.constant 0 : index
    %c0_19 = arith.constant 0 : index
    %51 = vector.load %arg5[%c0_17, %c0_18, %c0_19] : memref<1x1x128xf32, #tpu.memory_space<vmem>>, vector<1x1x128xf32>
    %52 = vector.shape_cast %50 : vector<1x128xf32> to vector<1x1x128xf32>
    %cst_20 = arith.constant 0.000000e+00 : f32
    %53 = vector.broadcast %cst_20 : f32 to vector<1x1x128xf32>
    %54 = arith.subf %53, %52 : vector<1x1x128xf32>
    %55 = arith.addf %51, %54 : vector<1x1x128xf32>
    %c0_21 = arith.constant 0 : index
    %c0_22 = arith.constant 0 : index
    %c0_23 = arith.constant 0 : index
    %56 = vector.load %arg5[%c0_21, %c0_22, %c0_23] : memref<1x1x128xf32, #tpu.memory_space<vmem>>, vector<1x1x128xf32>
    tpu.vector_store %arg5[%c0_21, %c0_22, %c0_23], %55 {strides = array<i32>} : memref<1x1x128xf32, #tpu.memory_space<vmem>>, vector<1x1x128xf32>,
    return
  }
  func.func @transform_0(%arg0: i32, %arg1: i32) -> (i32, i32) {
    %c1_i32 = arith.constant 1 : i32
    %0 = arith.muli %arg0, %c1_i32 : i32
    %1 = arith.addi %0, %arg1 : i32
    %c0_i32 = arith.constant 0 : i32
    %c0_i32_0 = arith.constant 0 : i32
    return %1, %c0_i32 : i32, i32
  }
  func.func @transform_1(%arg0: i32, %arg1: i32) -> (i32, i32) {
    %c1_i32 = arith.constant 1 : i32
    %0 = arith.muli %arg0, %c1_i32 : i32
    %1 = arith.addi %0, %arg1 : i32
    %c0_i32 = arith.constant 0 : i32
    %c0_i32_0 = arith.constant 0 : i32
    return %1, %c0_i32 : i32, i32
  }
  func.func @transform_2(%arg0: i32, %arg1: i32) -> (i32, i32) {
    %c0_i32 = arith.constant 0 : i32
    %c0_i32_0 = arith.constant 0 : i32
    %c0_i32_1 = arith.constant 0 : i32
    return %c0_i32, %c0_i32_0 : i32, i32
  }
  func.func @transform_3(%arg0: i32, %arg1: i32) -> (i32, i32, i32) {
    %c0_i32 = arith.constant 0 : i32
    %c0_i32_0 = arith.constant 0 : i32
    %c0_i32_1 = arith.constant 0 : i32
    return %arg0, %c0_i32, %c0_i32_0 : i32, i32, i32
  }
}

</mosaic_0001>

<bundles_post_ra>
// kernel: tpu_custom_call.1
= control target key start
LH: loop header
LB: loop body
LE: loop exit
PB: predicated region body
PF: predicated region fallthrough
CT: control target
= control target key end

     0   :  { %8 = vsyncpa [#allocation3], 0  ;;  %s339_s0 = inlined_call_operand.hbm [shape: f32[16,128], index: 0, kind: input, shape index: {}]   ;;  %s340_s1 = inlined_call_operand.hbm [shape: bf16[16,128], index: 1, kind: input, shape index: {}]   ;;  %s341_s2 = inlined_call_operand.hbm [shape: f32[2,128], index: 2, kind: input, shape index: {}]   ;;  %s342_s3 = inlined_call_operand.hbm [shape: f32[1,1,128], index: 3, kind: output, shape index: {}]  }
   0x1   :  { %9 = vsyncpa [#allocation6], 0  ;;  %s36_s14 = sshll.u32 %s340_s1, 4  ;;  %s37_s14 = int_to_ptr.hbm [resolvable:$true] %s36_s14 }
   0x2   :  { %10 = vsyncpa [#allocation4], 0  ;;  %s298_s15 = smov [#allocation5]   ;;  %s19_s19 = sshll.u32 %s339_s0, 4  ;;  %s20_s19 = int_to_ptr.hbm [resolvable:$true] %s19_s19 }
   0x3   :  { %s38_s16 = sshll.u32 %s298_s15, 4  ;;  %s299_s20 = smov 64   ;;  %s39_s16 = int_to_ptr.vmem [resolvable:$true] %s38_s16 }
   0x4   :  { %s300_s21 = smov 4   ;;  %s301_s22 = smov [#allocation2]  }
   0x5   :  { %44 = dma.hbm_to_vmem [thread:$0]  %s37_s14, 128, %s39_s16, [#allocation6], %s299_s20, %s299_s20, %s300_s21  }
   0x6   :  { %s21_s23 = sshll.u32 %s301_s22, 4  ;;  %s302_s24 = smov 128   ;;  %s22_s23 = int_to_ptr.vmem [resolvable:$true] %s21_s23 }
   0x7   :  { %s303_s25 = smov 8   ;;  %s50_s27 = sshll.u32 %s341_s2, 4  ;;  %s51_s27 = int_to_ptr.hbm [resolvable:$true] %s50_s27 }
   0x8   :  { %27 = dma.hbm_to_vmem [thread:$0]  %s20_s19, 256, %s22_s23, [#allocation3], %s302_s24, %s302_s24, %s303_s25  }
   0x9   :  { %s304_s28 = smov [#allocation7]  }
   0xa   :  { %s52_s29 = sshll.u32 %s304_s28, 4  ;;  %s53_s29 = int_to_ptr.vmem [resolvable:$true] %s52_s29 }
   0xb   :  { %55 = dma.hbm_to_vmem [thread:$0]  %s51_s27, 32, %s53_s29, [#allocation6]  }
   0xc   :  { %292 = dma.done.wait [#allocation3], 256  }
   0xd   :  { %293 = vsyncadd [#allocation3], 4294967040 }
   0xe   :  { %294 = dma.done.wait [#allocation6], 160  }
   0xf   :  { %295 = vsyncadd [#allocation6], 4294967136  ;;  %v305_v0 = vmov 0.0   ;;  %v79_v1 = vld [vmem:[#allocation2] sm:$0xff]  ;;  %v80_v2 = vld [vmem:[#allocation2 + $0x8] sm:$0xff]  ;;  %s306_s0 = smov [#allocation8]  }
  0x10   :  { %76 = vst [vmem:[#allocation8] sm:$0x1] %v305_v0  ;;  %v85_v3 = vmul.f32 0.5, %v79_v1  ;;  %v86_v4 = vmul.f32 0.5, %v80_v2  ;;  %v170_v19 = vld [vmem:[#allocation5] sm:$0xff]   ;;  %s154_s2 = sshll.u32 %s306_s0, 4  ;;  %s155_s2 = int_to_ptr.vmem [resolvable:$true] %s154_s2 }
  0x11   :  { %v171_v22 = vunpack.c.l.bf16 %v170_v19  ;;  %v172_v24 = vunpack.c.h.bf16 %v170_v19  ;;  %v182_v27 = vld [vmem:[#allocation7] ss:$0 sm:$0xff]  ;;  %v183_v42 = vld [vmem:[#allocation7 + $0x1] ss:$0 sm:$0xff]  ;;  %s156_s5 = sshll.u32 %s342_s3, 4  ;;  %s157_s5 = int_to_ptr.hbm [resolvable:$true] %s156_s5 }
  0x12   :  { %184 = vtanh.f32 %v85_v3 }
  0x13   :  { %186 = vtanh.f32 %v86_v4  ;;  %v109_v33 = vsub.f32 1.0, %v171_v22  ;;  %v110_v37 = vsub.f32 1.0, %v172_v24  ;;  %v128_v41 = vmul.f32 %v182_v27, %v171_v22 }
  0x14   :  { %v129_v45 = vmul.f32 %v182_v27, %v172_v24 }
  0x15   :  { %v131_v51 = vadd.f32 %v183_v42, %v128_v41 }
  0x16   :  { %v132_v53 = vadd.f32 %v183_v42, %v129_v45 }
  0x17   :  { %v145_v1 = vld [vmem:[#allocation8] sm:$0x1] }
  0x18   :  { %v185_v5 = vpop.eup %184 }
  0x19   :  { %v187_v6 = vpop.eup %186  ;;  %v89_v7 = vadd.f32 1.0, %v185_v5 }
  0x1a   :  { %v90_v8 = vadd.f32 1.0, %v187_v6 }
  0x1b   :  { %v91_v9 = vmul.f32 0.5, %v89_v7 }
  0x1c   :  { %v92_v10 = vmul.f32 0.5, %v90_v8 }
  0x1d   :  { %v167_v11 = vadd.f32 -0.05, %v91_v9  ;;  %v97_v12 = vmax.f32 %v91_v9, 1e-08  ;;  %v105_v32 = vsub.f32 1.0, %v91_v9 }
  0x1e   :  { %v168_v13 = vadd.f32 -0.05, %v92_v10  ;;  %v98_v14 = vmax.f32 %v92_v10, 1e-08  ;;  %v106_v36 = vsub.f32 1.0, %v92_v10 }
  0x1f   :  { %v95_v15 = vmax.f32 %v167_v11, 0.0  ;;  %188 = vlog2.f32 %v97_v12 }
  0x20   :  { %v96_v16 = vmax.f32 %v168_v13, 0.0  ;;  %190 = vlog2.f32 %v98_v14 }
  0x21   :  { %v111_v17 = vsub.f32 1.0, %v95_v15  ;;  %v121_v26 = vmul.f32 %v95_v15, %v95_v15 }
  0x22   :  { %v112_v18 = vsub.f32 1.0, %v96_v16  ;;  %v122_v29 = vmul.f32 %v96_v16, %v96_v16 }
  0x23   :  { %192 = vlog2.f32 %v111_v17  ;;  %v123_v40 = vmul.f32 %v121_v26, %v121_v26 }
  0x24   :  { %194 = vlog2.f32 %v112_v18  ;;  %v124_v44 = vmul.f32 %v122_v29, %v122_v29 }
  0x25   :  { %v189_v20 = vpop.eup %188 }
  0x26   :  { %v191_v21 = vpop.eup %190  ;;  %v100_v23 = vmul.f32 0.6931472, %v189_v20 }
  0x27   :  { %v102_v25 = vmul.f32 0.6931472, %v191_v21 }
  0x28   :  { %v103_v31 = vmul.f32 %v171_v22, %v100_v23 }
  0x29   :  { %v193_v28 = vpop.eup %192  ;;  %v104_v35 = vmul.f32 %v172_v24, %v102_v25 }
  0x2a   :  { %v195_v30 = vpop.eup %194  ;;  %v114_v34 = vmul.f32 0.6931472, %v193_v28  ;;  %v107_v46 = vmul.f32 %v105_v32, %v103_v31 }
  0x2b   :  { %v116_v38 = vmul.f32 0.6931472, %v195_v30  ;;  %v108_v48 = vmul.f32 %v106_v36, %v104_v35 }
  0x2c   :  { %v117_v39 = vmax.f32 %v114_v34, 1e-08 }
  0x2d   :  { %v118_v43 = vmax.f32 %v116_v38, 1e-08 }
  0x2e   :  { %v119_v47 = vmul.f32 %v117_v39, %v109_v33 }
  0x2f   :  { %v120_v49 = vmul.f32 %v118_v43, %v110_v37 }
  0x30   :  { %v125_v50 = vmul.f32 %v123_v40, %v119_v47 }
  0x31   :  { %v126_v52 = vmul.f32 %v124_v44, %v120_v49 }
  0x32   :  { %v133_v54 = vadd.f32 %v125_v50, %v107_v46 }
  0x33   :  { %v134_v55 = vadd.f32 %v126_v52, %v108_v48 }
  0x34   :  { %v135_v56 = vmul.f32 %v133_v54, %v131_v51 }
  0x35   :  { %v136_v57 = vmul.f32 %v134_v55, %v132_v53 }
  0x37   :  { %v137_v58 = vadd.f32 %v136_v57, %v135_v56 }
  0x39   :  { %v138_v59 = vrot.slane %v137_v58, 4 }
  0x3b   :  { %v139_v60 = vadd.f32 %v138_v59, %v137_v58 }
  0x3d   :  { %v140_v61 = vrot.slane %v139_v60, 2 }
  0x3f   :  { %v141_v62 = vadd.f32 %v140_v61, %v139_v60 }
  0x41   :  { %v142_v63 = vrot.slane %v141_v62, 1 }
  0x43   :  { %v143_v0 = vadd.f32 %v142_v63, %v141_v62 }
  0x45   :  { %v146_v2 = vsub.f32 0.0, %v143_v0 }
  0x47   :  { %v147_v3 = vadd.f32 %v146_v2, %v145_v1 }
  0x49   :  { %148 = vst [vmem:[#allocation8] sm:$0x1] %v147_v3 }
  0x4a   :  { %159 = dma.vmem_to_hbm [thread:$0]  %s155_s2, 16, %s157_s5, [#allocation4]  }
  0x4b   :  { %296 = dma.done.wait [#allocation4], 16  }
  0x4c   :  { %297 = vsyncadd [#allocation4], 4294967280 }
  0x4d   :  { %164 = vsyncpa [#allocation3], 1 }
  0x4e   :  { %165 = vsyncpa [#allocation6], 1 }
  0x4f   :  { %166 = vsyncpa [#allocation4], 1 }

</bundles_post_ra>
